<compile_context>
chip_gen: v5e
topology: v5e:2x2
jax: 0.10.0
libtpu: 0.0.40
codegen_flags: <defaults>
</compile_context>

<pallas_src>
import functools

import jax
import jax.numpy as jnp
import numpy as np
from jax.experimental import pallas as pl
from jax.experimental.pallas import tpu as pltpu
from jax.scipy.linalg import block_diag

VMEM = pl.BlockSpec(memory_space=pltpu.MemorySpace.VMEM)
NEG_BIG = float(np.finfo(np.float32).min)
BN_EPS = 1e-5


# --------------------------------------------------------------------------------------
# Single fused Pallas kernel: edge MLP -> adjacencies -> conv/BN/relu/skip chain ->
# global max pool -> final Linear.
# --------------------------------------------------------------------------------------
def _fused_forward_kernel(*refs, n_hidden, n_nodes):
    n_convs = 1 + 2 * n_hidden
    (x_ref, ea_ref, dst1h_ref, src1h_ref, mask_ref,
     w1s_ref, b1s_ref, w2bd_ref, b2s_ref) = refs[:9]
    conv_w_refs = refs[9:9 + 2 * n_convs:2]          # per-conv node weight (Cin, C)
    conv_b_refs = refs[10:9 + 2 * n_convs:2]         # per-conv bias       (1, C)
    lin_w_ref, lin_b_ref, out_ref, pool_scr = refs[9 + 2 * n_convs:]

    # ---- (1) edge MLP for ALL conv layers at once (stacked lin1, block-diag lin2) ----
    h = jnp.dot(ea_ref[...], w1s_ref[...], preferred_element_type=jnp.float32) + b1s_ref[...]
    h = jnp.maximum(h, 0.0)
    we = jax.nn.sigmoid(
        jnp.dot(h, w2bd_ref[...], preferred_element_type=jnp.float32) + b2s_ref[...]
    )                                                 # (E, n_convs): column l = layer-l edge weights

    # ---- (2) self-loop identity (inputs carry no self-loops -> fill value 1.0) ----
    rows = jax.lax.broadcasted_iota(jnp.int32, (n_nodes, n_nodes), 0)
    cols = jax.lax.broadcasted_iota(jnp.int32, (n_nodes, n_nodes), 1)
    eye = (rows == cols).astype(jnp.float32)
    dst1h = dst1h_ref[...]                            # (N, E) one-hot dst per edge
    src1h = src1h_ref[...]                            # (E, N) one-hot src per edge

    def pdnconv(x, layer):
        # Dense adjacency A[dst, src] = w_e built via MXU, + remaining self-loops.
        a = jnp.dot(dst1h, we[:, layer:layer + 1] * src1h,
                    preferred_element_type=jnp.float32) + eye
        deg = jnp.sum(a, axis=1, keepdims=True)                   # degree over dst rows
        dinv = jnp.where(deg > 0.0, jax.lax.rsqrt(deg), 0.0)      # masked_fill(inf, 0)
        xw = jnp.dot(x, conv_w_refs[layer][...], preferred_element_type=jnp.float32)
        return dinv * jnp.dot(a, dinv * xw, preferred_element_type=jnp.float32) \
            + conv_b_refs[layer][...]

    def bn_relu(x):
        # Fresh training-mode BatchNorm1d (gamma=1, beta=0, biased variance), then relu.
        inv_n = 1.0 / x.shape[0]
        mean = jnp.sum(x, axis=0, keepdims=True) * inv_n
        xc = x - mean
        var = jnp.sum(xc * xc, axis=0, keepdims=True) * inv_n
        return jnp.maximum(xc * jax.lax.rsqrt(var + BN_EPS), 0.0)

    # ---- (3) conv / skip chain, entirely in vregs ----
    x = pdnconv(x_ref[...], 0)                        # conv1
    x0 = x
    for i in range(n_hidden):                         # hidden_conv_1 (pre-BN + relu)
        x = pdnconv(bn_relu(x), 1 + i)
    x1 = x + x0
    x = x + x0
    for i in range(n_hidden):                         # hidden_conv_2 (pre-BN + relu)
        x = pdnconv(bn_relu(x), 1 + n_hidden + i)
    x2 = jnp.maximum(x + x0 + x1, 0.0)

    # ---- (4) per-graph global max pool into a VMEM scratch, then final Linear ----
    mask = mask_ref[...]                              # (N, G) one-hot membership
    n_graphs = mask.shape[1]
    for g in range(n_graphs):                         # static loop, G is tiny
        mg = mask[:, g:g + 1]
        pool_scr[g:g + 1, :] = jnp.max(jnp.where(mg > 0.5, x2, NEG_BIG),
                                       axis=0, keepdims=True)
    # TODO(synk): F.dropout implemented as identity (driver calls with p=0.0).
    out_ref[...] = jnp.dot(pool_scr[...], lin_w_ref[...],
                           preferred_element_type=jnp.float32) + lin_b_ref[...]


# --------------------------------------------------------------------------------------
# Wrapper: stack edge-MLP params, build one-hot incidence matrices, one pallas_call.
# --------------------------------------------------------------------------------------
def model_forward(params, x, src, dst, edge_attr, mask_t):
    n_nodes = x.shape[0]
    n_hidden = len(params["hidden1"])
    conv_params = [params["conv1"]] + list(params["hidden1"]) + list(params["hidden2"])
    n_convs = len(conv_params)
    c = params["lin_w"].shape[0]
    n_graphs = mask_t.shape[1]
    n_classes = params["lin_w"].shape[1]

    # Static one-hot incidence matrices -> adjacency is built in-kernel on the MXU
    # (no XLA scatter, no HBM roundtrip of w_e / A).
    dst1h = (dst[None, :] == jnp.arange(n_nodes)[:, None]).astype(jnp.float32)   # (N, E)
    src1h = (src[:, None] == jnp.arange(n_nodes)[None, :]).astype(jnp.float32)   # (E, N)

    # Batch the layer-invariant edge MLP across all conv layers.
    w1s = jnp.concatenate([p["m1_w"] for p in conv_params], axis=1)     # (Fe, L*Fe)
    b1s = jnp.concatenate([p["m1_b"] for p in conv_params], axis=1)     # (1, L*Fe)
    w2bd = block_diag(*[p["m2_w"].T for p in conv_params])              # (L*Fe, L)
    b2s = jnp.concatenate([p["m2_b"] for p in conv_params], axis=1)     # (1, L)

    conv_args = []
    for p in conv_params:
        conv_args += [p["lin_w"], p["bias"]]

    n_inputs = 9 + 2 * n_convs + 2
    return pl.pallas_call(
        functools.partial(_fused_forward_kernel, n_hidden=n_hidden, n_nodes=n_nodes),
        out_shape=jax.ShapeDtypeStruct((n_graphs, n_classes), jnp.float32),
        in_specs=[VMEM] * n_inputs,
        out_specs=VMEM,
        scratch_shapes=[pltpu.VMEM((n_graphs, c), jnp.float32)],
    )(x, edge_attr, dst1h, src1h, mask_t, w1s, b1s, w2bd, b2s,
      *conv_args, params["lin_w"], params["lin_b"])


forward_jit = jax.jit(model_forward)


# --------------------------------------------------------------------------------------
# Parameter construction
# --------------------------------------------------------------------------------------
def init_pdn_params(key, cin, cout, fe):
    ks = jax.random.split(key, 6)
    return {
        "lin_w": jax.random.normal(ks[0], (cin, cout), jnp.float32) * 0.2,  # Linear(cin,cout,bias=False), pre-T
        "bias": jax.random.normal(ks[1], (1, cout), jnp.float32) * 0.1,     # PDNConv bias
        "m1_w": jax.random.normal(ks[2], (fe, fe), jnp.float32) * 0.3,      # Linear(fe,fe), pre-T
        "m1_b": jax.random.normal(ks[3], (1, fe), jnp.float32) * 0.1,
        "m2_w": jax.random.normal(ks[4], (1, fe), jnp.float32) * 0.3,       # Linear(fe,1) weight row
        "m2_b": jax.random.normal(ks[5], (1, 1), jnp.float32) * 0.1,
    }


# --------------------------------------------------------------------------------------
if __name__ == "__main__":
    # dataset.num_node_features=12, num_edge_features=8, out_channels=32, num_classes=4,
    # n_hidden_layers=1, two graphs of 8 nodes each.
    N, E, F_NODE, F_EDGE, C, N_CLASSES, G, N_HIDDEN = 16, 32, 12, 8, 32, 4, 2, 1

    key = jax.random.PRNGKey(0)
    ks = jax.random.split(key, 8)

    x_in = jax.random.normal(ks[0], (N, F_NODE), jnp.float32)
    src = jax.random.randint(ks[1], (E,), 0, N)
    dst_raw = jax.random.randint(ks[2], (E,), 0, N)
    dst = jnp.where(dst_raw == src, (dst_raw + 1) % N, dst_raw)     # no input self-loops
    edge_attr = jax.random.uniform(ks[3], (E, F_EDGE), jnp.float32)

    batch = jnp.concatenate(
        [jnp.zeros(N // 2, jnp.int32), jnp.ones(N // 2, jnp.int32)]
    )                                                               # (N,) graph id per node
    mask_t = (batch[:, None] == jnp.arange(G)[None, :]).astype(jnp.float32)  # (N, G)

    params = {
        "conv1": init_pdn_params(ks[4], F_NODE, C, F_EDGE),
        "hidden1": [
            init_pdn_params(jax.random.fold_in(ks[5], i), C, C, F_EDGE)
            for i in range(N_HIDDEN)
        ],
        "hidden2": [
            init_pdn_params(jax.random.fold_in(ks[5], 100 + i), C, C, F_EDGE)
            for i in range(N_HIDDEN)
        ],
        "lin_w": jax.random.normal(ks[6], (C, N_CLASSES), jnp.float32) * 0.2,
        "lin_b": jax.random.normal(ks[7], (1, N_CLASSES), jnp.float32) * 0.1,
    }

    # dropout p = 0.0 -> identity (handled inside the fused kernel as a no-op).
    out = jax.block_until_ready(forward_jit(params, x_in, src, dst, edge_attr, mask_t))
    assert out.shape == (G, N_CLASSES), out.shape
    assert bool(jnp.all(jnp.isfinite(out)))
    print("KERNEL_OK")
</pallas_src>

<mosaic_0001>
module attributes {stable_mosaic.version = 11 : i64} {
  func.func @_fused_forward_kernel(%arg0: memref<16x12xf32, #tpu.memory_space<vmem>>, %arg1: memref<32x8xf32, #tpu.memory_space<vmem>>, %arg2: memref<16x32xf32, #tpu.memory_space<vmem>>, %arg3: memref<32x16xf32, #tpu.memory_space<vmem>>, %arg4: memref<16x2xf32, #tpu.memory_space<vmem>>, %arg5: memref<8x24xf32, #tpu.memory_space<vmem>>, %arg6: memref<1x24xf32, #tpu.memory_space<vmem>>, %arg7: memref<24x3xf32, #tpu.memory_space<vmem>>, %arg8: memref<1x3xf32, #tpu.memory_space<vmem>>, %arg9: memref<12x32xf32, #tpu.memory_space<vmem>>, %arg10: memref<1x32xf32, #tpu.memory_space<vmem>>, %arg11: memref<32x32xf32, #tpu.memory_space<vmem>>, %arg12: memref<1x32xf32, #tpu.memory_space<vmem>>, %arg13: memref<32x32xf32, #tpu.memory_space<vmem>>, %arg14: memref<1x32xf32, #tpu.memory_space<vmem>>, %arg15: memref<32x4xf32, #tpu.memory_space<vmem>>, %arg16: memref<1x4xf32, #tpu.memory_space<vmem>>, %arg17: memref<2x4xf32, #tpu.memory_space<vmem>>, %arg18: memref<2x32xf32, #tpu.memory_space<vmem>>) attributes {dimension_semantics = [], scalar_prefetch = 0 : i64, scratch_operands = 1 : i64, tpu.core_type = #tpu.core_type<tc>} {
    %c0 = arith.constant 0 : index
    %c0_0 = arith.constant 0 : index
    %0 = vector.load %arg1[%c0, %c0_0] : memref<32x8xf32, #tpu.memory_space<vmem>>, vector<32x8xf32>
    %c0_1 = arith.constant 0 : index
    %c0_2 = arith.constant 0 : index
    %1 = vector.load %arg5[%c0_1, %c0_2] : memref<8x24xf32, #tpu.memory_space<vmem>>, vector<8x24xf32>
    %cst = arith.constant dense<0.000000e+00> : vector<32x24xf32>
    %2 = tpu.matmul %0, %1, %cst {dimension_numbers = #tpu.dot_dimension_numbers<[1], [0], [0], [1], [0, 0, 1, 1], [], []>} : vector<32x8xf32>, vector<8x24xf32>, vector<32x24xf32> -> vector<32x24xf32>
    %c0_3 = arith.constant 0 : index
    %c0_4 = arith.constant 0 : index
    %3 = vector.load %arg6[%c0_3, %c0_4] : memref<1x24xf32, #tpu.memory_space<vmem>>, vector<1x24xf32>
    %4 = vector.broadcast %3 : vector<1x24xf32> to vector<32x24xf32>
    %5 = arith.addf %2, %4 : vector<32x24xf32>
    %cst_5 = arith.constant 0.000000e+00 : f32
    %6 = vector.broadcast %cst_5 : f32 to vector<32x24xf32>
    %7 = arith.maximumf %5, %6 : vector<32x24xf32>
    %c0_6 = arith.constant 0 : index
    %c0_7 = arith.constant 0 : index
    %8 = vector.load %arg7[%c0_6, %c0_7] : memref<24x3xf32, #tpu.memory_space<vmem>>, vector<24x3xf32>
    %cst_8 = arith.constant dense<0.000000e+00> : vector<32x3xf32>
    %9 = tpu.matmul %7, %8, %cst_8 {dimension_numbers = #tpu.dot_dimension_numbers<[1], [0], [0], [1], [0, 0, 1, 1], [], []>} : vector<32x24xf32>, vector<24x3xf32>, vector<32x3xf32> -> vector<32x3xf32>
    %c0_9 = arith.constant 0 : index
    %c0_10 = arith.constant 0 : index
    %10 = vector.load %arg8[%c0_9, %c0_10] : memref<1x3xf32, #tpu.memory_space<vmem>>, vector<1x3xf32>
    %11 = vector.broadcast %10 : vector<1x3xf32> to vector<32x3xf32>
    %12 = arith.addf %9, %11 : vector<32x3xf32>
    %13 = arith.negf %12 : vector<32x3xf32>
    %14 = math.exp %13 : vector<32x3xf32>
    %cst_11 = arith.constant 1.000000e+00 : f32
    %15 = vector.broadcast %cst_11 : f32 to vector<32x3xf32>
    %16 = arith.addf %15, %14 : vector<32x3xf32>
    %17 = arith.divf %15, %16 : vector<32x3xf32>
    %18 = tpu.iota {dimensions = array<i32: 0>} : vector<16x16xi32>
    %19 = tpu.iota {dimensions = array<i32: 1>} : vector<16x16xi32>
    %20 = arith.cmpi eq, %18, %19 : vector<16x16xi32>
    %21 = arith.extui %20 : vector<16x16xi1> to vector<16x16xi32>
    %22 = arith.sitofp %21 : vector<16x16xi32> to vector<16x16xf32>
    %c0_12 = arith.constant 0 : index
    %c0_13 = arith.constant 0 : index
    %23 = vector.load %arg2[%c0_12, %c0_13] : memref<16x32xf32, #tpu.memory_space<vmem>>, vector<16x32xf32>
    %c0_14 = arith.constant 0 : index
    %c0_15 = arith.constant 0 : index
    %24 = vector.load %arg3[%c0_14, %c0_15] : memref<32x16xf32, #tpu.memory_space<vmem>>, vector<32x16xf32>
    %c0_16 = arith.constant 0 : index
    %c0_17 = arith.constant 0 : index
    %25 = vector.load %arg0[%c0_16, %c0_17] : memref<16x12xf32, #tpu.memory_space<vmem>>, vector<16x12xf32>
    %26 = vector.extract_strided_slice %17 {offsets = [0, 0], sizes = [32, 1], strides = [1, 1]} : vector<32x3xf32> to vector<32x1xf32>
    %27 = vector.broadcast %26 : vector<32x1xf32> to vector<32x16xf32>
    %28 = arith.mulf %27, %24 : vector<32x16xf32>
    %cst_18 = arith.constant dense<0.000000e+00> : vector<16x16xf32>
    %29 = tpu.matmul %23, %28, %cst_18 {dimension_numbers = #tpu.dot_dimension_numbers<[1], [0], [0], [1], [0, 0, 1, 1], [], []>} : vector<16x32xf32>, vector<32x16xf32>, vector<16x16xf32> -> vector<16x16xf32>
    %30 = arith.addf %29, %22 : vector<16x16xf32>
    %cst_19 = arith.constant dense<0.000000e+00> : vector<16xf32>
    %31 = vector.multi_reduction <add>, %30, %cst_19 [1] : vector<16x16xf32> to vector<16xf32>
    %32 = vector.shape_cast %31 : vector<16xf32> to vector<16x1xf32>
    %cst_20 = arith.constant 0.000000e+00 : f32
    %33 = vector.broadcast %cst_20 : f32 to vector<16x1xf32>
    %34 = arith.cmpf ogt, %32, %33 : vector<16x1xf32>
    %35 = math.rsqrt %32 : vector<16x1xf32>
    %cst_21 = arith.constant 0.000000e+00 : f32
    %36 = vector.broadcast %cst_21 : f32 to vector<16x1xf32>
    %37 = arith.select %34, %35, %36 : vector<16x1xi1>, vector<16x1xf32>
    %c0_22 = arith.constant 0 : index
    %c0_23 = arith.constant 0 : index
    %38 = vector.load %arg9[%c0_22, %c0_23] : memref<12x32xf32, #tpu.memory_space<vmem>>, vector<12x32xf32>
    %cst_24 = arith.constant dense<0.000000e+00> : vector<16x32xf32>
    %39 = tpu.matmul %25, %38, %cst_24 {dimension_numbers = #tpu.dot_dimension_numbers<[1], [0], [0], [1], [0, 0, 1, 1], [], []>} : vector<16x12xf32>, vector<12x32xf32>, vector<16x32xf32> -> vector<16x32xf32>
    %40 = vector.broadcast %37 : vector<16x1xf32> to vector<16x32xf32>
    %41 = arith.mulf %40, %39 : vector<16x32xf32>
    %cst_25 = arith.constant dense<0.000000e+00> : vector<16x32xf32>
    %42 = tpu.matmul %30, %41, %cst_25 {dimension_numbers = #tpu.dot_dimension_numbers<[1], [0], [0], [1], [0, 0, 1, 1], [], []>} : vector<16x16xf32>, vector<16x32xf32>, vector<16x32xf32> -> vector<16x32xf32>
    %43 = vector.broadcast %37 : vector<16x1xf32> to vector<16x32xf32>
    %44 = arith.mulf %43, %42 : vector<16x32xf32>
    %c0_26 = arith.constant 0 : index
    %c0_27 = arith.constant 0 : index
    %45 = vector.load %arg10[%c0_26, %c0_27] : memref<1x32xf32, #tpu.memory_space<vmem>>, vector<1x32xf32>
    %46 = vector.broadcast %45 : vector<1x32xf32> to vector<16x32xf32>
    %47 = arith.addf %44, %46 : vector<16x32xf32>
    %cst_28 = arith.constant dense<0.000000e+00> : vector<32xf32>
    %48 = vector.multi_reduction <add>, %47, %cst_28 [0] : vector<16x32xf32> to vector<32xf32>
    %49 = vector.shape_cast %48 : vector<32xf32> to vector<1x32xf32>
    %cst_29 = arith.constant 6.250000e-02 : f32
    %50 = vector.broadcast %cst_29 : f32 to vector<1x32xf32>
    %51 = arith.mulf %49, %50 : vector<1x32xf32>
    %52 = vector.broadcast %51 : vector<1x32xf32> to vector<16x32xf32>
    %53 = arith.subf %47, %52 : vector<16x32xf32>
    %54 = arith.mulf %53, %53 : vector<16x32xf32>
    %cst_30 = arith.constant dense<0.000000e+00> : vector<32xf32>
    %55 = vector.multi_reduction <add>, %54, %cst_30 [0] : vector<16x32xf32> to vector<32xf32>
    %56 = vector.shape_cast %55 : vector<32xf32> to vector<1x32xf32>
    %cst_31 = arith.constant 6.250000e-02 : f32
    %57 = vector.broadcast %cst_31 : f32 to vector<1x32xf32>
    %58 = arith.mulf %56, %57 : vector<1x32xf32>
    %cst_32 = arith.constant 9.99999974E-6 : f32
    %59 = vector.broadcast %cst_32 : f32 to vector<1x32xf32>
    %60 = arith.addf %58, %59 : vector<1x32xf32>
    %61 = math.rsqrt %60 : vector<1x32xf32>
    %62 = vector.broadcast %61 : vector<1x32xf32> to vector<16x32xf32>
    %63 = arith.mulf %53, %62 : vector<16x32xf32>
    %cst_33 = arith.constant 0.000000e+00 : f32
    %64 = vector.broadcast %cst_33 : f32 to vector<16x32xf32>
    %65 = arith.maximumf %63, %64 : vector<16x32xf32>
    %66 = vector.extract_strided_slice %17 {offsets = [0, 1], sizes = [32, 1], strides = [1, 1]} : vector<32x3xf32> to vector<32x1xf32>
    %67 = vector.broadcast %66 : vector<32x1xf32> to vector<32x16xf32>
    %68 = arith.mulf %67, %24 : vector<32x16xf32>
    %cst_34 = arith.constant dense<0.000000e+00> : vector<16x16xf32>
    %69 = tpu.matmul %23, %68, %cst_34 {dimension_numbers = #tpu.dot_dimension_numbers<[1], [0], [0], [1], [0, 0, 1, 1], [], []>} : vector<16x32xf32>, vector<32x16xf32>, vector<16x16xf32> -> vector<16x16xf32>
    %70 = arith.addf %69, %22 : vector<16x16xf32>
    %cst_35 = arith.constant dense<0.000000e+00> : vector<16xf32>
    %71 = vector.multi_reduction <add>, %70, %cst_35 [1] : vector<16x16xf32> to vector<16xf32>
    %72 = vector.shape_cast %71 : vector<16xf32> to vector<16x1xf32>
    %cst_36 = arith.constant 0.000000e+00 : f32
    %73 = vector.broadcast %cst_36 : f32 to vector<16x1xf32>
    %74 = arith.cmpf ogt, %72, %73 : vector<16x1xf32>
    %75 = math.rsqrt %72 : vector<16x1xf32>
    %cst_37 = arith.constant 0.000000e+00 : f32
    %76 = vector.broadcast %cst_37 : f32 to vector<16x1xf32>
    %77 = arith.select %74, %75, %76 : vector<16x1xi1>, vector<16x1xf32>
    %c0_38 = arith.constant 0 : index
    %c0_39 = arith.constant 0 : index
    %78 = vector.load %arg11[%c0_38, %c0_39] : memref<32x32xf32, #tpu.memory_space<vmem>>, vector<32x32xf32>
    %cst_40 = arith.constant dense<0.000000e+00> : vector<16x32xf32>
    %79 = tpu.matmul %65, %78, %cst_40 {dimension_numbers = #tpu.dot_dimension_numbers<[1], [0], [0], [1], [0, 0, 1, 1], [], []>} : vector<16x32xf32>, vector<32x32xf32>, vector<16x32xf32> -> vector<16x32xf32>
    %80 = vector.broadcast %77 : vector<16x1xf32> to vector<16x32xf32>
    %81 = arith.mulf %80, %79 : vector<16x32xf32>
    %cst_41 = arith.constant dense<0.000000e+00> : vector<16x32xf32>
    %82 = tpu.matmul %70, %81, %cst_41 {dimension_numbers = #tpu.dot_dimension_numbers<[1], [0], [0], [1], [0, 0, 1, 1], [], []>} : vector<16x16xf32>, vector<16x32xf32>, vector<16x32xf32> -> vector<16x32xf32>
    %83 = vector.broadcast %77 : vector<16x1xf32> to vector<16x32xf32>
    %84 = arith.mulf %83, %82 : vector<16x32xf32>
    %c0_42 = arith.constant 0 : index
    %c0_43 = arith.constant 0 : index
    %85 = vector.load %arg12[%c0_42, %c0_43] : memref<1x32xf32, #tpu.memory_space<vmem>>, vector<1x32xf32>
    %86 = vector.broadcast %85 : vector<1x32xf32> to vector<16x32xf32>
    %87 = arith.addf %84, %86 : vector<16x32xf32>
    %88 = arith.addf %87, %47 : vector<16x32xf32>
    %89 = arith.addf %87, %47 : vector<16x32xf32>
    %cst_44 = arith.constant dense<0.000000e+00> : vector<32xf32>
    %90 = vector.multi_reduction <add>, %89, %cst_44 [0] : vector<16x32xf32> to vector<32xf32>
    %91 = vector.shape_cast %90 : vector<32xf32> to vector<1x32xf32>
    %cst_45 = arith.constant 6.250000e-02 : f32
    %92 = vector.broadcast %cst_45 : f32 to vector<1x32xf32>
    %93 = arith.mulf %91, %92 : vector<1x32xf32>
    %94 = vector.broadcast %93 : vector<1x32xf32> to vector<16x32xf32>
    %95 = arith.subf %89, %94 : vector<16x32xf32>
    %96 = arith.mulf %95, %95 : vector<16x32xf32>
    %cst_46 = arith.constant dense<0.000000e+00> : vector<32xf32>
    %97 = vector.multi_reduction <add>, %96, %cst_46 [0] : vector<16x32xf32> to vector<32xf32>
    %98 = vector.shape_cast %97 : vector<32xf32> to vector<1x32xf32>
    %cst_47 = arith.constant 6.250000e-02 : f32
    %99 = vector.broadcast %cst_47 : f32 to vector<1x32xf32>
    %100 = arith.mulf %98, %99 : vector<1x32xf32>
    %cst_48 = arith.constant 9.99999974E-6 : f32
    %101 = vector.broadcast %cst_48 : f32 to vector<1x32xf32>
    %102 = arith.addf %100, %101 : vector<1x32xf32>
    %103 = math.rsqrt %102 : vector<1x32xf32>
    %104 = vector.broadcast %103 : vector<1x32xf32> to vector<16x32xf32>
    %105 = arith.mulf %95, %104 : vector<16x32xf32>
    %cst_49 = arith.constant 0.000000e+00 : f32
    %106 = vector.broadcast %cst_49 : f32 to vector<16x32xf32>
    %107 = arith.maximumf %105, %106 : vector<16x32xf32>
    %108 = vector.extract_strided_slice %17 {offsets = [0, 2], sizes = [32, 1], strides = [1, 1]} : vector<32x3xf32> to vector<32x1xf32>
    %109 = vector.broadcast %108 : vector<32x1xf32> to vector<32x16xf32>
    %110 = arith.mulf %109, %24 : vector<32x16xf32>
    %cst_50 = arith.constant dense<0.000000e+00> : vector<16x16xf32>
    %111 = tpu.matmul %23, %110, %cst_50 {dimension_numbers = #tpu.dot_dimension_numbers<[1], [0], [0], [1], [0, 0, 1, 1], [], []>} : vector<16x32xf32>, vector<32x16xf32>, vector<16x16xf32> -> vector<16x16xf32>
    %112 = arith.addf %111, %22 : vector<16x16xf32>
    %cst_51 = arith.constant dense<0.000000e+00> : vector<16xf32>
    %113 = vector.multi_reduction <add>, %112, %cst_51 [1] : vector<16x16xf32> to vector<16xf32>
    %114 = vector.shape_cast %113 : vector<16xf32> to vector<16x1xf32>
    %cst_52 = arith.constant 0.000000e+00 : f32
    %115 = vector.broadcast %cst_52 : f32 to vector<16x1xf32>
    %116 = arith.cmpf ogt, %114, %115 : vector<16x1xf32>
    %117 = math.rsqrt %114 : vector<16x1xf32>
    %cst_53 = arith.constant 0.000000e+00 : f32
    %118 = vector.broadcast %cst_53 : f32 to vector<16x1xf32>
    %119 = arith.select %116, %117, %118 : vector<16x1xi1>, vector<16x1xf32>
    %c0_54 = arith.constant 0 : index
    %c0_55 = arith.constant 0 : index
    %120 = vector.load %arg13[%c0_54, %c0_55] : memref<32x32xf32, #tpu.memory_space<vmem>>, vector<32x32xf32>
    %cst_56 = arith.constant dense<0.000000e+00> : vector<16x32xf32>
    %121 = tpu.matmul %107, %120, %cst_56 {dimension_numbers = #tpu.dot_dimension_numbers<[1], [0], [0], [1], [0, 0, 1, 1], [], []>} : vector<16x32xf32>, vector<32x32xf32>, vector<16x32xf32> -> vector<16x32xf32>
    %122 = vector.broadcast %119 : vector<16x1xf32> to vector<16x32xf32>
    %123 = arith.mulf %122, %121 : vector<16x32xf32>
    %cst_57 = arith.constant dense<0.000000e+00> : vector<16x32xf32>
    %124 = tpu.matmul %112, %123, %cst_57 {dimension_numbers = #tpu.dot_dimension_numbers<[1], [0], [0], [1], [0, 0, 1, 1], [], []>} : vector<16x16xf32>, vector<16x32xf32>, vector<16x32xf32> -> vector<16x32xf32>
    %125 = vector.broadcast %119 : vector<16x1xf32> to vector<16x32xf32>
    %126 = arith.mulf %125, %124 : vector<16x32xf32>
    %c0_58 = arith.constant 0 : index
    %c0_59 = arith.constant 0 : index
    %127 = vector.load %arg14[%c0_58, %c0_59] : memref<1x32xf32, #tpu.memory_space<vmem>>, vector<1x32xf32>
    %128 = vector.broadcast %127 : vector<1x32xf32> to vector<16x32xf32>
    %129 = arith.addf %126, %128 : vector<16x32xf32>
    %130 = arith.addf %129, %47 : vector<16x32xf32>
    %131 = arith.addf %130, %88 : vector<16x32xf32>
    %cst_60 = arith.constant 0.000000e+00 : f32
    %132 = vector.broadcast %cst_60 : f32 to vector<16x32xf32>
    %133 = arith.maximumf %131, %132 : vector<16x32xf32>
    %c0_61 = arith.constant 0 : index
    %c0_62 = arith.constant 0 : index
    %134 = vector.load %arg4[%c0_61, %c0_62] : memref<16x2xf32, #tpu.memory_space<vmem>>, vector<16x2xf32>
    %135 = vector.extract_strided_slice %134 {offsets = [0, 0], sizes = [16, 1], strides = [1, 1]} : vector<16x2xf32> to vector<16x1xf32>
    %cst_63 = arith.constant 5.000000e-01 : f32
    %136 = vector.broadcast %cst_63 : f32 to vector<16x1xf32>
    %137 = arith.cmpf ogt, %135, %136 : vector<16x1xf32>
    %cst_64 = arith.constant -3.40282347E+38 : f32
    %138 = vector.shape_cast %137 : vector<16x1xi1> to vector<16x1xi1>
    %139 = vector.broadcast %138 : vector<16x1xi1> to vector<16x32xi1>
    %140 = vector.broadcast %cst_64 : f32 to vector<16x32xf32>
    %141 = arith.select %139, %133, %140 : vector<16x32xi1>, vector<16x32xf32>
    %cst_65 = arith.constant dense<0xFF800000> : vector<32xf32>
    %142 = vector.multi_reduction <maximumf>, %141, %cst_65 [0] : vector<16x32xf32> to vector<32xf32>
    %143 = vector.shape_cast %142 : vector<32xf32> to vector<1x32xf32>
    %c0_66 = arith.constant 0 : index
    %c0_67 = arith.constant 0 : index
    %144 = vector.load %arg18[%c0_66, %c0_67] : memref<2x32xf32, #tpu.memory_space<vmem>>, vector<1x32xf32>
    tpu.vector_store %arg18[%c0_66, %c0_67], %143 {strides = array<i32>} : memref<2x32xf32, #tpu.memory_space<vmem>>, vector<1x32xf32>,
    %145 = vector.extract_strided_slice %134 {offsets = [0, 1], sizes = [16, 1], strides = [1, 1]} : vector<16x2xf32> to vector<16x1xf32>
    %cst_68 = arith.constant 5.000000e-01 : f32
    %146 = vector.broadcast %cst_68 : f32 to vector<16x1xf32>
    %147 = arith.cmpf ogt, %145, %146 : vector<16x1xf32>
    %cst_69 = arith.constant -3.40282347E+38 : f32
    %148 = vector.shape_cast %147 : vector<16x1xi1> to vector<16x1xi1>
    %149 = vector.broadcast %148 : vector<16x1xi1> to vector<16x32xi1>
    %150 = vector.broadcast %cst_69 : f32 to vector<16x32xf32>
    %151 = arith.select %149, %133, %150 : vector<16x32xi1>, vector<16x32xf32>
    %cst_70 = arith.constant dense<0xFF800000> : vector<32xf32>
    %152 = vector.multi_reduction <maximumf>, %151, %cst_70 [0] : vector<16x32xf32> to vector<32xf32>
    %153 = vector.shape_cast %152 : vector<32xf32> to vector<1x32xf32>
    %c1 = arith.constant 1 : index
    %c0_71 = arith.constant 0 : index
    %154 = vector.load %arg18[%c1, %c0_71] : memref<2x32xf32, #tpu.memory_space<vmem>>, vector<1x32xf32>
    tpu.vector_store %arg18[%c1, %c0_71], %153 {strides = array<i32>} : memref<2x32xf32, #tpu.memory_space<vmem>>, vector<1x32xf32>,
    %c0_72 = arith.constant 0 : index
    %c0_73 = arith.constant 0 : index
    %155 = vector.load %arg18[%c0_72, %c0_73] : memref<2x32xf32, #tpu.memory_space<vmem>>, vector<2x32xf32>
    %c0_74 = arith.constant 0 : index
    %c0_75 = arith.constant 0 : index
    %156 = vector.load %arg15[%c0_74, %c0_75] : memref<32x4xf32, #tpu.memory_space<vmem>>, vector<32x4xf32>
    %cst_76 = arith.constant dense<0.000000e+00> : vector<2x4xf32>
    %157 = tpu.matmul %155, %156, %cst_76 {dimension_numbers = #tpu.dot_dimension_numbers<[1], [0], [0], [1], [0, 0, 1, 1], [], []>} : vector<2x32xf32>, vector<32x4xf32>, vector<2x4xf32> -> vector<2x4xf32>
    %c0_77 = arith.constant 0 : index
    %c0_78 = arith.constant 0 : index
    %158 = vector.load %arg16[%c0_77, %c0_78] : memref<1x4xf32, #tpu.memory_space<vmem>>, vector<1x4xf32>
    %159 = vector.broadcast %158 : vector<1x4xf32> to vector<2x4xf32>
    %160 = arith.addf %157, %159 : vector<2x4xf32>
    %c0_79 = arith.constant 0 : index
    %c0_80 = arith.constant 0 : index
    %161 = vector.load %arg17[%c0_79, %c0_80] : memref<2x4xf32, #tpu.memory_space<vmem>>, vector<2x4xf32>
    tpu.vector_store %arg17[%c0_79, %c0_80], %160 {strides = array<i32>} : memref<2x4xf32, #tpu.memory_space<vmem>>, vector<2x4xf32>,
    return
  }
}

</mosaic_0001>

<bundles_post_ra>
// kernel: model_forward.1
= control target key start
LH: loop header
LB: loop body
LE: loop exit
PB: predicated region body
PF: predicated region fallthrough
CT: control target
= control target key end

     0   :  { %s1363_s0 = inlined_call_operand.vmem [shape: f32[16,12], index: 0, kind: input, shape index: {}]   ;;  %s1364_s1 = inlined_call_operand.vmem [shape: f32[32,8], index: 1, kind: input, shape index: {}]   ;;  %s1365_s2 = inlined_call_operand.vmem [shape: f32[16,32], index: 2, kind: input, shape index: {}]   ;;  %s1366_s3 = inlined_call_operand.vmem [shape: f32[32,16], index: 3, kind: input, shape index: {}]   ;;  %s1367_s4 = inlined_call_operand.vmem [shape: f32[16,2], index: 4, kind: input, shape index: {}]   ;;  %s1368_s5 = inlined_call_operand.vmem [shape: f32[8,24], index: 5, kind: input, shape index: {}]   ;;  %s1369_s6 = inlined_call_operand.vmem [shape: f32[1,24], index: 6, kind: input, shape index: {}]   ;;  %s1370_s7 = inlined_call_operand.vmem [shape: f32[24,3], index: 7, kind: input, shape index: {}]   ;;  %s1371_s8 = inlined_call_operand.vmem [shape: f32[1,3], index: 8, kind: input, shape index: {}]   ;;  %s1372_s9 = inlined_call_operand.vmem [shape: f32[12,32], index: 9, kind: input, shape index: {}]   ;;  %s1373_s10 = inlined_call_operand.vmem [shape: f32[1,32], index: 10, kind: input, shape index: {}]   ;;  %s1374_s11 = inlined_call_operand.vmem [shape: f32[32,32], index: 11, kind: input, shape index: {}]   ;;  %s1375_s12 = inlined_call_operand.vmem [shape: f32[1,32], index: 12, kind: input, shape index: {}]   ;;  %s1376_s13 = inlined_call_operand.vmem [shape: f32[32,32], index: 13, kind: input, shape index: {}]   ;;  %s1377_s14 = inlined_call_operand.vmem [shape: f32[1,32], index: 14, kind: input, shape index: {}]   ;;  %s1378_s15 = inlined_call_operand.vmem [shape: f32[32,4], index: 15, kind: input, shape index: {}]   ;;  %s1379_s16 = inlined_call_operand.vmem [shape: f32[1,4], index: 16, kind: input, shape index: {}]   ;;  %s1380_s17 = inlined_call_operand.hbm [shape: f32[2,4], index: 17, kind: output, shape index: {}]  }
   0x1   :  { %1383 = sst [smem:[#allocation6_spill]] %s1363_s0 }
   0x2   :  { %1384 = sst [smem:[#allocation7_spill]] %s1364_s1 }
   0x3   :  { %v61_v0 = vld [vmem:[%s1368_s5] sm:$0xff]  ;;  %s1385_s28 = sld [smem:[#allocation7_spill]]  ;;  %vm66_vm0 = vcmask 64512  }
   0x4   :  { %94 = vmatpush.msra.mxu0 %v61_v0  ;;  %923 = vmatpush.msra.mxu1 %v61_v0 }
   0x9   :  { %v57_v1 = vld [vmem:[%s1385_s28] sm:$0xff]  ;;  %v60_v2 = vld [vmem:[%s1385_s28 + $0x18] sm:$0xff] }
   0xa   :  { %889 = vmatmul.msk.f32.vlgmr.msra.gmra.mxu0 %vm66_vm0, %v57_v1  ;;  %892 = vmatmul.msk.f32.vlgmr.msra.gmra.mxu1 %vm66_vm0, %v60_v2 }
   0xb   :  { %22 = vsyncpa [#allocation4], 0  ;;  %v58_v3 = vld [vmem:[%s1385_s28 + $0x8] sm:$0xff]  ;;  %v59_v4 = vld [vmem:[%s1385_s28 + $0x10] sm:$0xff]  ;;  %vm119_vm1 = vcmask 195584   ;;  %v1003_v25 = vmov 0  }
   0xc   :  { %v114_v5 = vld [vmem:[%s1370_s7 + $0x10] sm:$0xff]  ;;  %v113_v6 = vld [vmem:[%s1370_s7 + $0x8] sm:$0xff]  ;;  %v112_v7 = vld [vmem:[%s1370_s7] sm:$0xff]  ;;  %930 = vset.pattern.permute.xlu1 %v1003_v25  ;;  %929 = vset.pattern.permute.xlu0 %v1003_v25  ;;  %v1004_v38 = vmov 1   ;;  %s1386_s7 = sld [smem:[#allocation6_spill]]  ;;  %s1007_s18 = smov [#allocation3]  }
   0xd   :  { %145 = vmatpush.msrb.mxu1 %v114_v5  ;;  %v939_v8 = vld [vmem:[%s1369_s6] ss:$0 sm:$0xff]  ;;  %933 = vset.pattern.permute.xlu2 %v1004_v38  ;;  %s878_s5 = sshll.u32 %s1007_s18, 4  ;;  %s879_s5 = int_to_ptr.vmem [resolvable:$true] %s878_s5 }
   0xe   :  { %v940_v21 = vld [vmem:[%s1371_s8] ss:$0 sm:$0xff] }
   0xf   :  { %146 = vmatpush.msrb.mxu1 %v113_v6 }
  0x11   :  { %147 = vmatpush.msrb.mxu1 %v112_v7 }
  0x12   :  { %890 = vmatmul.msk.f32.gmra.mxu0 %vm66_vm0, %v58_v3 }
  0x1a   :  { %891 = vmatmul.msk.f32.gmra.mxu0 %vm66_vm0, %v59_v4 }
  0x87   :  { %v96_v9 = vpop.f32.mrf.mxu0  ;;  %v105_v17 = vpop.f32.mrf.mxu1 }
  0x88   :  { %v97_v10 = vadd.f32 %v939_v8, %v96_v9  ;;  %v106_v19 = vadd.f32 %v939_v8, %v105_v17 }
  0x8a   :  { %v108_v11 = vmax.f32 %v97_v10, 0.0  ;;  %v111_v20 = vmax.f32 %v106_v19, 0.0 }
  0x8c   :  { %893 = vmatmul.msk.f32.vlgmr.msrb.gmra.mxu1 %vm119_vm1, %v108_v11 }
  0x8f   :  { %v99_v12 = vpop.f32.mrf.mxu0 }
  0x90   :  { %v100_v13 = vadd.f32 %v939_v8, %v99_v12 }
  0x92   :  { %v109_v14 = vmax.f32 %v100_v13, 0.0 }
  0x94   :  { %894 = vmatmul.msk.f32.gmra.mxu1 %vm119_vm1, %v109_v14 }
  0x97   :  { %v102_v15 = vpop.f32.mrf.mxu0 }
  0x98   :  { %v103_v16 = vadd.f32 %v939_v8, %v102_v15 }
  0x9a   :  { %v110_v18 = vmax.f32 %v103_v16, 0.0 }
  0x9c   :  { %895 = vmatmul.msk.f32.gmra.mxu1 %vm119_vm1, %v110_v18 }
  0xa4   :  { %896 = vmatmul.msk.f32.gmra.mxu1 %vm119_vm1, %v111_v20 }
 0x109   :  { %v149_v22 = vpop.f32.mrf.mxu1 }
 0x10a   :  { %v150_v23 = vadd.f32 %v940_v21, %v149_v22 }
 0x10c   :  { %v897_v24 = vmul.f32 -1.442695, %v150_v23 }
 0x10e   :  { %945 = vpow2.f32 %v897_v24 }
 0x111   :  { %v152_v26 = vpop.f32.mrf.mxu1 }
 0x112   :  { %v153_v27 = vadd.f32 %v940_v21, %v152_v26  ;;  %v1159_v26 = vld [vmem:[%s1366_s3 + $0x8] sm:$0xff] }
 0x114   :  { %v946_v28 = vpop.eup %945  ;;  %v898_v29 = vmul.f32 -1.442695, %v153_v27  ;;  %v1164_v27 = vld [vmem:[%s1366_s3 + $0x10] sm:$0xff] }
 0x115   :  { %v173_v30 = vadd.f32 1.0, %v946_v28 }
 0x116   :  { %947 = vpow2.f32 %v898_v29 }
 0x117   :  { %949 = vrcp.f32 %v173_v30  ;;  %v188_v61 = vand.u32 2147483648, %v173_v30  ;;  %vm182_vm7 = vweird.f32 %v173_v30  ;;  %v186_v63 = vand.u32 2147483647, %v173_v30 }
 0x119   :  { %v155_v31 = vpop.f32.mrf.mxu1  ;;  %v189_v2 = vor.u32 1.1754944e-38, %v188_v61  ;;  %vm187_vm9 = vcmp.eq.f32.partialorder %v186_v63, 8.507059e+37 }
 0x11a   :  { %v156_v32 = vadd.f32 %v940_v21, %v155_v31 }
 0x11c   :  { %v948_v33 = vpop.eup %947  ;;  %v899_v34 = vmul.f32 -1.442695, %v156_v32 }
 0x11d   :  { %v174_v35 = vadd.f32 1.0, %v948_v33  ;;  %v950_v36 = vpop.eup %949  ;;  %v1177_v33 = vld [vmem:[%s1365_s2] sm:$0xff] }
 0x11e   :  { %951 = vpow2.f32 %v899_v34  ;;  %v178_v42 = vmul.f32 %v950_v36, %v173_v30  ;;  %vm183_vm6 = vweird.f32 %v950_v36  ;;  %v1170_v30 = vld [vmem:[%s1366_s3] sm:$0xff] }
 0x11f   :  { %953 = vrcp.f32 %v174_v35  ;;  %v203_v48 = vand.u32 2147483648, %v174_v35  ;;  %v201_v50 = vand.u32 2147483647, %v174_v35  ;;  %vm197_vm3 = vweird.f32 %v174_v35  ;;  %vm184_vm8 = vmor %vm182_vm7, %vm183_vm6 }
 0x120   :  { %v179_v47 = vsub.f32 1.0, %v178_v42  ;;  %v254_v42 = vld [vmem:[%s1386_s7] sm:$0xff]  ;;  %vm310_vm7 = vcmask 130048  }
 0x121   :  { %v158_v37 = vpop.f32.mrf.mxu1  ;;  %v204_v56 = vor.u32 1.1754944e-38, %v203_v48  ;;  %vm202_vm5 = vcmp.eq.f32.partialorder %v201_v50, 8.507059e+37 }
 0x122   :  { %v159_v39 = vadd.f32 %v940_v21, %v158_v37  ;;  %v180_v53 = vmul.f32 %v950_v36, %v179_v47  ;;  %v1153_v21 = vld [vmem:[%s1366_s3 + $0x18] sm:$0xff] }
 0x124   :  { %v952_v40 = vpop.eup %951  ;;  %v900_v41 = vmul.f32 -1.442695, %v159_v39  ;;  %v181_v60 = vadd.f32 %v950_v36, %v180_v53  ;;  %v1186_v39 = vld [vmem:[%s1365_s2 + $0x8] sm:$0xff] }
 0x125   :  { %v954_v43 = vpop.eup %953  ;;  %v175_v44 = vadd.f32 1.0, %v952_v40  ;;  %v342_v40 = vld [vmem:[%s1372_s9 + $0x8] sm:$0xf] }
 0x126   :  { %955 = vpow2.f32 %v900_v41  ;;  %v193_v45 = vmul.f32 %v954_v43, %v174_v35  ;;  %vm198_vm2 = vweird.f32 %v954_v43  ;;  %v185_v0 = vsel %vm184_vm8, %v950_v36, %v181_v60  ;;  %v341_v41 = vld [vmem:[%s1372_s9] sm:$0xff] }
 0x127   :  { %957 = vrcp.f32 %v175_v44  ;;  %vm199_vm4 = vmor %vm197_vm3, %vm198_vm2  ;;  %v1134_v5 = vsel %vm187_vm9, %v189_v2, %v185_v0  ;;  %v218_v11 = vand.u32 2147483648, %v175_v44  ;;  %vm212_vm12 = vweird.f32 %v175_v44 }
 0x128   :  { %v194_v46 = vsub.f32 1.0, %v193_v45  ;;  %v216_v12 = vand.u32 2147483647, %v175_v44  ;;  %vm280_vm2 = vcmask 261120   ;;  %vm350_vm3 = vcmask 1043456  }
 0x129   :  { %v219_v17 = vor.u32 1.1754944e-38, %v218_v11  ;;  %905 = vmatpush.msk.msra.mxu3 %vm350_vm3, %v342_v40 }
 0x12a   :  { %v195_v49 = vmul.f32 %v954_v43, %v194_v46  ;;  %vm217_vm1 = vcmp.eq.f32.partialorder %v216_v12, 8.507059e+37 }
 0x12b   :  { %369 = vmatpush.msra.mxu3 %v341_v41 }
 0x12c   :  { %v956_v51 = vpop.eup %955  ;;  %v196_v52 = vadd.f32 %v954_v43, %v195_v49  ;;  %v1005_v49 = vmov 0.0  }
 0x12d   :  { %v958_v54 = vpop.eup %957  ;;  %v176_v55 = vadd.f32 1.0, %v956_v51 }
 0x12e   :  { %v200_v57 = vsel %vm199_vm4, %v954_v43, %v196_v52  ;;  %v208_v58 = vmul.f32 %v958_v54, %v175_v44  ;;  %vm213_vm10 = vweird.f32 %v958_v54  ;;  %vm343_vm4 = vcmask 97280   ;;  %v255_v43 = vld [vmem:[%s1386_s7 + $0x8] sm:$0xff] }
 0x12f   :  { %959 = vrcp.f32 %v176_v55  ;;  %v1131_v59 = vsel %vm202_vm5, %v204_v56, %v200_v57  ;;  %v233_v7 = vand.u32 2147483648, %v176_v55  ;;  %v231_v10 = vand.u32 2147483647, %v176_v55  ;;  %vm214_vm14 = vmor %vm212_vm12, %vm213_vm10  ;;  %906 = vmatmul.msk.f32.vlgmr.msra.gmra.mxu3 %vm343_vm4, %v254_v42 }
 0x130   :  { %263 = vperm.xlu1 %930, %v1131_v59   ;;  %v209_v62 = vsub.f32 1.0, %v208_v58  ;;  %vm227_vm13 = vweird.f32 %v176_v55  ;;  %v237_v44 = vlaneseq  ;;  %v1006_v57 = vmov 2  }
 0x131   :  { %v234_v14 = vor.u32 1.1754944e-38, %v233_v7  ;;  %vm232_vm0 = vcmp.eq.f32.partialorder %v231_v10, 8.507059e+37 }
 0x132   :  { %v210_v3 = vmul.f32 %v958_v54, %v209_v62  ;;  %v238_v45 = vshrl.u32 %v237_v44, 7  ;;  %v241_v48 = vand.u32 127, %v237_v44 }
 0x134   :  { %v211_v8 = vadd.f32 %v958_v54, %v210_v3  ;;  %v239_v46 = vadd.s32 8, %v238_v45  ;;  %vm242_vm6 = vcmp.eq.s32.totalorder %v238_v45, %v241_v48 }
 0x135   :  { %v960_v1 = vpop.eup %959 }
 0x136   :  { %v223_v4 = vmul.f32 %v960_v1, %v176_v55  ;;  %vm228_vm11 = vweird.f32 %v960_v1  ;;  %v215_v15 = vsel %vm214_vm14, %v958_v54, %v211_v8  ;;  %vm243_vm5 = vcmp.eq.s32.totalorder %v239_v46, %v241_v48 }
 0x137   :  { %vm229_vm15 = vmor %vm227_vm13, %vm228_vm11  ;;  %v1141_v19 = vsel %vm217_vm1, %v219_v17, %v215_v15  ;;  %907 = vmatmul.msk.f32.gmra.mxu3 %vm343_vm4, %v255_v43  ;;  %v1202_v50 = vsel %vm243_vm5, 1.0, %v1005_v49  ;;  %v1209_v54 = vsel %vm242_vm6, 1.0, %v1005_v49 }
 0x138   :  { %258 = vperm.xlu1 %930, %v1134_v5   ;;  %v224_v6 = vsub.f32 1.0, %v223_v4 }
 0x13a   :  { %v225_v9 = vmul.f32 %v960_v1, %v224_v6 }
 0x13c   :  { %v226_v13 = vadd.f32 %v960_v1, %v225_v9 }
 0x13e   :  { %v230_v16 = vsel %vm229_vm15, %v960_v1, %v226_v13 }
 0x13f   :  { %v1137_v18 = vsel %vm232_vm0, %v234_v14, %v230_v16 }
 0x140   :  { %273 = vperm.xlu0 %929, %v1137_v18   ;;  %932 = vset.pattern.permute.xlu1 %v1004_v38 }
 0x141   :  { %464 = vperm.xlu1 %932, %v1141_v19  }
 0x148   :  { %268 = vperm.xlu0 %929, %v1141_v19  }
 0x149   :  { %456 = vperm.xlu1 %932, %v1134_v5  }
 0x150   :  { %931 = vset.pattern.permute.xlu0 %v1004_v38 }
 0x151   :  { %468 = vperm.xlu0 %931, %v1137_v18   ;;  %935 = vset.pattern.permute.xlu1 %v1003_v25 }
 0x159   :  { %936 = vset.pattern.permute.xlu0 %v1003_v25 }
 0x1a2   :  { %v264_v20 = vpop.permute.xlu1 %263 }
 0x1a3   :  { %v277_v31 = vmul.f32 %v264_v20, %v1159_v26 }
 0x1aa   :  { %v259_v24 = vpop.permute.xlu1 %258 }
 0x1ab   :  { %v276_v32 = vmul.f32 %v259_v24, %v1170_v30 }
 0x1b2   :  { %v274_v22 = vpop.permute.xlu0 %273  ;;  %v371_v61 = vpop.f32.mrf.mxu3 }
 0x1b3   :  { %v279_v23 = vmul.f32 %v274_v22, %v1153_v21  ;;  %v465_v34 = vpop.permute.xlu1 %464 }
 0x1b4   :  { %v473_v37 = vmul.f32 %v465_v34, %v1164_v27  ;;  %v531_v34 = vld [vmem:[%s1374_s11 + $0x18] sm:$0xff] }
 0x1b5   :  { %299 = vmatpush.msra.mxu2 %v279_v23  ;;  %550 = vmatpush.msrb.mxu0 %v531_v34 }
 0x1ba   :  { %v269_v28 = vpop.permute.xlu0 %268 }
 0x1bb   :  { %v278_v29 = vmul.f32 %v269_v28, %v1164_v27  ;;  %v457_v4 = vpop.permute.xlu1 %456 }
 0x1bc   :  { %v471_v11 = vmul.f32 %v457_v4, %v1170_v30 }
 0x1bd   :  { %300 = vmatpush.msra.mxu2 %v278_v29 }
 0x1bf   :  { %301 = vmatpush.msra.mxu2 %v277_v31 }
 0x1c1   :  { %302 = vmatpush.msra.mxu2 %v276_v32 }
 0x1c2   :  { %903 = vmatmul.msk.f32.vlgmr.msra.gmra.mxu2 %vm280_vm2, %v1177_v33 }
 0x1c3   :  { %v469_v35 = vpop.permute.xlu0 %468 }
 0x1c4   :  { %v474_v36 = vmul.f32 %v469_v35, %v1153_v21 }
 0x1c6   :  { %487 = vmatpush.msrb.mxu2 %v474_v36  ;;  %v941_v36 = vld [vmem:[%s1373_s10] ss:$0 sm:$0xff] }
 0x1c8   :  { %488 = vmatpush.msrb.mxu2 %v473_v37 }
 0x1ca   :  { %904 = vmatmul.msk.f32.gmra.mxu2 %vm280_vm2, %v1186_v39 }
 0x245   :  { %v304_v47 = vpop.f32.mrf.mxu2 }
 0x246   :  { %v305_v55 = vadd.f32 %v1209_v54, %v304_v47 }
 0x248   :  { %v311_v56 = vsel %vm310_vm7, %v305_v55, 0.0 }
 0x24d   :  { %v307_v51 = vpop.f32.mrf.mxu2 }
 0x24e   :  { %v1205_v52 = vadd.f32 %v1202_v50, %v307_v51 }
 0x250   :  { %v314_v53 = vsel %vm310_vm7, %v1205_v52, 0.0 }
 0x251   :  { %315 = vadd.xlane.f32.xlu2 %v314_v53 }
 0x259   :  { %312 = vadd.xlane.f32.xlu2 %v311_v56 }
 0x271   :  { %460 = vperm.xlu2 %933, %v1131_v59  }
 0x279   :  { %934 = vset.pattern.permute.xlu2 %v1006_v57 }
 0x27a   :  { %654 = vperm.xlu2 %934, %v1137_v18  }
 0x282   :  { %650 = vperm.xlu2 %934, %v1141_v19  }
 0x28a   :  { %646 = vperm.xlu2 %934, %v1131_v59  }
 0x292   :  { %642 = vperm.xlu2 %934, %v1134_v5   ;;  %v374_v5 = vpop.f32.mrf.mxu3 }
 0x2c4   :  { %v316_v58 = vpop.xlane.xlu2 %315 }
 0x2c5   :  { %961 = vrsqrt.f32 %v316_v58  ;;  %vm335_vm9 = vweird.f32 %v316_v58  ;;  %vm318_vm11 = vcmp.gt.f32.partialorder %v316_v58, 0.0 }
 0x2cb   :  { %v962_v60 = vpop.eup %961 }
 0x2cc   :  { %v330_v62 = vmul.f32 %v962_v60, %v316_v58  ;;  %v313_v63 = vpop.xlane.xlu2 %312  ;;  %vm336_vm8 = vweird.f32 %v962_v60 }
 0x2cd   :  { %963 = vrsqrt.f32 %v313_v63  ;;  %vm337_vm10 = vmor %vm335_vm9, %vm336_vm8  ;;  %vm325_vm13 = vweird.f32 %v313_v63  ;;  %vm317_vm15 = vcmp.gt.f32.partialorder %v313_v63, 0.0 }
 0x2ce   :  { %v331_v0 = vmul.f32 %v962_v60, %v330_v62 }
 0x2d0   :  { %v332_v1 = vmul.f32 0.5, %v331_v0 }
 0x2d2   :  { %v333_v2 = vsub.f32 1.5, %v332_v1 }
 0x2d3   :  { %v964_v3 = vpop.eup %963 }
 0x2d4   :  { %v320_v6 = vmul.f32 %v964_v3, %v313_v63  ;;  %v461_v7 = vpop.permute.xlu2 %460  ;;  %v334_v8 = vmul.f32 %v962_v60, %v333_v2  ;;  %vm326_vm12 = vweird.f32 %v964_v3 }
 0x2d5   :  { %v472_v59 = vmul.f32 %v461_v7, %v1159_v26  ;;  %vm327_vm14 = vmor %vm325_vm13, %vm326_vm12 }
 0x2d6   :  { %v321_v9 = vmul.f32 %v964_v3, %v320_v6  ;;  %v338_v10 = vsel %vm337_vm10, %v962_v60, %v334_v8 }
 0x2d7   :  { %v340_v12 = vsel %vm318_vm11, %v338_v10, 0.0  ;;  %489 = vmatpush.msrb.mxu2 %v472_v59 }
 0x2d8   :  { %v322_v13 = vmul.f32 0.5, %v321_v9  ;;  %v378_v14 = vmul.f32 %v374_v5, %v340_v12 }
 0x2d9   :  { %490 = vmatpush.msrb.mxu2 %v471_v11 }
 0x2da   :  { %v323_v15 = vsub.f32 1.5, %v322_v13  ;;  %399 = vmatpush.msrb.mxu3 %v378_v14  ;;  %910 = vmatmul.msk.f32.vlgmr.msrb.gmra.mxu2 %vm280_vm2, %v1177_v33 }
 0x2dc   :  { %v324_v16 = vmul.f32 %v964_v3, %v323_v15  ;;  %v655_v17 = vpop.permute.xlu2 %654 }
 0x2dd   :  { %v660_v18 = vmul.f32 %v655_v17, %v1153_v21 }
 0x2de   :  { %v328_v19 = vsel %vm327_vm14, %v964_v3, %v324_v16 }
 0x2df   :  { %v339_v20 = vsel %vm317_vm15, %v328_v19, 0.0  ;;  %673 = vmatpush.msra.mxu1 %v660_v18 }
 0x2e0   :  { %v377_v22 = vmul.f32 %v371_v61, %v339_v20 }
 0x2e2   :  { %400 = vmatpush.msrb.mxu3 %v377_v22  ;;  %911 = vmatmul.msk.f32.gmra.mxu2 %vm280_vm2, %v1186_v39 }
 0x2e3   :  { %908 = vmatmul.msk.f32.vlgmr.msrb.gmra.mxu3 %vm310_vm7, %v305_v55 }
 0x2e4   :  { %v651_v23 = vpop.permute.xlu2 %650 }
 0x2e5   :  { %v659_v24 = vmul.f32 %v651_v23, %v1164_v27 }
 0x2e7   :  { %674 = vmatpush.msra.mxu1 %v659_v24 }
 0x2eb   :  { %909 = vmatmul.msk.f32.gmra.mxu3 %vm310_vm7, %v1205_v52 }
 0x2ec   :  { %v647_v28 = vpop.permute.xlu2 %646 }
 0x2ed   :  { %v658_v21 = vmul.f32 %v647_v28, %v1159_v26  ;;  %v530_v26 = vld [vmem:[%s1374_s11 + $0x10] sm:$0xff] }
 0x2ee   :  { %551 = vmatpush.msrb.mxu0 %v530_v26 }
 0x2ef   :  { %675 = vmatpush.msra.mxu1 %v658_v21 }
 0x2f4   :  { %v643_v29 = vpop.permute.xlu2 %642 }
 0x2f5   :  { %v657_v31 = vmul.f32 %v643_v29, %v1170_v30  ;;  %v529_v30 = vld [vmem:[%s1374_s11 + $0x8] sm:$0xff] }
 0x2f6   :  { %552 = vmatpush.msrb.mxu0 %v529_v30 }
 0x2f7   :  { %676 = vmatpush.msra.mxu1 %v657_v31 }
 0x2f8   :  { %916 = vmatmul.msk.f32.vlgmr.msra.gmra.mxu1 %vm280_vm2, %v1177_v33 }
 0x300   :  { %917 = vmatmul.msk.f32.gmra.mxu1 %vm280_vm2, %v1186_v39  ;;  %v528_v39 = vld [vmem:[%s1374_s11] sm:$0xff]  ;;  %s880_s11 = sshll.u32 %s1380_s17, 4  ;;  %s881_s11 = int_to_ptr.hbm [resolvable:$true] %s880_s11 }
 0x301   :  { %553 = vmatpush.msrb.mxu0 %v528_v39 }
 0x35d   :  { %v492_v27 = vpop.f32.mrf.mxu2 }
 0x35e   :  { %v1242_v35 = vadd.f32 %v1209_v54, %v492_v27 }
 0x360   :  { %v498_v37 = vsel %vm310_vm7, %v1242_v35, 0.0 }
 0x361   :  { %499 = vadd.xlane.f32.xlu1 %v498_v37 }
 0x365   :  { %v495_v43 = vpop.f32.mrf.mxu2 }
 0x366   :  { %v402_v32 = vpop.f32.mrf.mxu3  ;;  %v1260_v45 = vadd.f32 %v1202_v50, %v495_v43 }
 0x367   :  { %v408_v33 = vmul.f32 %v402_v32, %v339_v20 }
 0x368   :  { %v501_v48 = vsel %vm310_vm7, %v1260_v45, 0.0 }
 0x369   :  { %v1255_v41 = vadd.f32 %v941_v36, %v408_v33  ;;  %502 = vadd.xlane.f32.xlu0 %v501_v48 }
 0x36b   :  { %v416_v46 = vsel %vm280_vm2, %v1255_v41, 0.0 }
 0x36e   :  { %v405_v40 = vpop.f32.mrf.mxu3 }
 0x36f   :  { %v409_v42 = vmul.f32 %v405_v40, %v340_v12 }
 0x371   :  { %v1257_v44 = vadd.f32 %v941_v36, %v409_v42 }
 0x373   :  { %v417_v47 = vsel %vm280_vm2, %v1257_v44, 0.0 }
 0x374   :  { %v418_v49 = vadd.f32 %v417_v47, %v416_v46 }
 0x376   :  { %v419_v51 = vrot.slane %v418_v49, 4 }
 0x378   :  { %v420_v52 = vadd.f32 %v419_v51, %v418_v49 }
 0x37a   :  { %v421_v53 = vrot.slane %v420_v52, 2 }
 0x37c   :  { %v422_v55 = vadd.f32 %v421_v53, %v420_v52  ;;  %v942_v52 = vld [vmem:[%s1375_s12] ss:$0 sm:$0xff] }
 0x37e   :  { %v423_v56 = vrot.slane %v422_v55, 1 }
 0x380   :  { %v424_v57 = vadd.f32 %v423_v56, %v422_v55 }
 0x382   :  { %v425_v58 = vmul.f32 0.0625, %v424_v57 }
 0x384   :  { %v427_v60 = vsub.f32 %v1257_v44, %v425_v58  ;;  %v426_v61 = vsub.f32 %v1255_v41, %v425_v58 }
 0x386   :  { %v429_v62 = vmul.f32 %v427_v60, %v427_v60  ;;  %v428_v63 = vmul.f32 %v426_v61, %v426_v61 }
 0x388   :  { %v431_v0 = vsel %vm280_vm2, %v429_v62, 0.0  ;;  %v430_v1 = vsel %vm280_vm2, %v428_v63, 0.0 }
 0x389   :  { %v432_v2 = vadd.f32 %v431_v0, %v430_v1  ;;  %v678_v1 = vpop.f32.mrf.mxu1 }
 0x38b   :  { %v433_v3 = vrot.slane %v432_v2, 4 }
 0x38d   :  { %v434_v4 = vadd.f32 %v433_v3, %v432_v2  ;;  %v1292_v2 = vadd.f32 %v1209_v54, %v678_v1  ;;  %v717_v3 = vld [vmem:[%s1376_s13 + $0x18] sm:$0xff]  ;;  %v714_v54 = vld [vmem:[%s1376_s13] sm:$0xff] }
 0x38e   :  { %736 = vmatpush.msra.mxu2 %v717_v3 }
 0x38f   :  { %v435_v6 = vrot.slane %v434_v4, 2 }
 0x391   :  { %v436_v7 = vadd.f32 %v435_v6, %v434_v4  ;;  %v716_v4 = vld [vmem:[%s1376_s13 + $0x10] sm:$0xff] }
 0x392   :  { %737 = vmatpush.msra.mxu2 %v716_v4 }
 0x393   :  { %v437_v8 = vrot.slane %v436_v7, 1 }
 0x395   :  { %v438_v59 = vadd.f32 %v437_v8, %v436_v7  ;;  %v684_v7 = vsel %vm310_vm7, %v1292_v2, 0.0  ;;  %v715_v8 = vld [vmem:[%s1376_s13 + $0x8] sm:$0xff] }
 0x396   :  { %685 = vadd.xlane.f32.xlu0 %v684_v7  ;;  %738 = vmatpush.msra.mxu2 %v715_v8 }
 0x397   :  { %v439_v5 = vmul.f32 0.0625, %v438_v59 }
 0x398   :  { %739 = vmatpush.msra.mxu2 %v714_v54  ;;  %v943_v54 = vld [vmem:[%s1377_s14] ss:$0 sm:$0xff] }
 0x399   :  { %v440_v9 = vadd.f32 1e-05, %v439_v5 }
 0x39b   :  { %965 = vrsqrt.f32 %v440_v9  ;;  %vm447_vm1 = vweird.f32 %v440_v9 }
 0x3a1   :  { %v966_v10 = vpop.eup %965 }
 0x3a2   :  { %v442_v11 = vmul.f32 %v966_v10, %v440_v9  ;;  %vm448_vm0 = vweird.f32 %v966_v10 }
 0x3a3   :  { %vm449_vm3 = vmor %vm447_vm1, %vm448_vm0 }
 0x3a4   :  { %v443_v12 = vmul.f32 %v966_v10, %v442_v11 }
 0x3a6   :  { %v444_v13 = vmul.f32 0.5, %v443_v12 }
 0x3a8   :  { %v445_v14 = vsub.f32 1.5, %v444_v13 }
 0x3aa   :  { %v446_v15 = vmul.f32 %v966_v10, %v445_v14 }
 0x3ac   :  { %v450_v16 = vsel %vm449_vm3, %v966_v10, %v446_v15  ;;  %v681_v10 = vpop.f32.mrf.mxu1 }
 0x3ad   :  { %v451_v17 = vmul.f32 %v450_v16, %v426_v61  ;;  %v452_v19 = vmul.f32 %v450_v16, %v427_v60  ;;  %v1309_v11 = vadd.f32 %v1202_v50, %v681_v10 }
 0x3af   :  { %v453_v18 = vmax.f32 %v451_v17, 0.0  ;;  %v454_v20 = vmax.f32 %v452_v19, 0.0  ;;  %v687_v14 = vsel %vm310_vm7, %v1309_v11, 0.0 }
 0x3b0   :  { %688 = vadd.xlane.f32.xlu2 %v687_v14 }
 0x3b1   :  { %912 = vmatmul.msk.f32.vlgmr.msrb.gmra.mxu0 %vm280_vm2, %v453_v18 }
 0x3b9   :  { %913 = vmatmul.msk.f32.gmra.mxu0 %vm280_vm2, %v454_v20 }
 0x3d4   :  { %v500_v23 = vpop.xlane.xlu1 %499 }
 0x3d5   :  { %vm512_vm6 = vweird.f32 %v500_v23  ;;  %vm504_vm12 = vcmp.gt.f32.partialorder %v500_v23, 0.0 }
 0x3dc   :  { %v503_v22 = vpop.xlane.xlu0 %502 }
 0x3dd   :  { %967 = vrsqrt.f32 %v503_v22  ;;  %vm522_vm4 = vweird.f32 %v503_v22  ;;  %vm505_vm11 = vcmp.gt.f32.partialorder %v503_v22, 0.0 }
 0x3de   :  { %969 = vrsqrt.f32 %v500_v23 }
 0x3e3   :  { %v968_v24 = vpop.eup %967 }
 0x3e4   :  { %v970_v28 = vpop.eup %969  ;;  %v517_v21 = vmul.f32 %v968_v24, %v503_v22  ;;  %vm523_vm5 = vweird.f32 %v968_v24 }
 0x3e5   :  { %v507_v29 = vmul.f32 %v970_v28, %v500_v23  ;;  %vm513_vm8 = vweird.f32 %v970_v28  ;;  %vm524_vm9 = vmor %vm522_vm4, %vm523_vm5 }
 0x3e6   :  { %v518_v31 = vmul.f32 %v968_v24, %v517_v21  ;;  %vm514_vm10 = vmor %vm512_vm6, %vm513_vm8 }
 0x3e7   :  { %v508_v32 = vmul.f32 %v970_v28, %v507_v29 }
 0x3e8   :  { %v519_v27 = vmul.f32 0.5, %v518_v31 }
 0x3e9   :  { %v509_v34 = vmul.f32 0.5, %v508_v32 }
 0x3ea   :  { %v520_v26 = vsub.f32 1.5, %v519_v27 }
 0x3eb   :  { %v510_v30 = vsub.f32 1.5, %v509_v34 }
 0x3ec   :  { %v521_v36 = vmul.f32 %v968_v24, %v520_v26 }
 0x3ed   :  { %v511_v37 = vmul.f32 %v970_v28, %v510_v30 }
 0x3ee   :  { %v525_v39 = vsel %vm524_vm9, %v968_v24, %v521_v36 }
 0x3ef   :  { %v515_v40 = vsel %vm514_vm10, %v970_v28, %v511_v37  ;;  %v527_v42 = vsel %vm505_vm11, %v525_v39, 0.0 }
 0x3f0   :  { %v526_v47 = vsel %vm504_vm12, %v515_v40, 0.0 }
 0x42e   :  { %v555_v33 = vpop.f32.mrf.mxu0 }
 0x42f   :  { %v561_v48 = vmul.f32 %v555_v33, %v526_v47 }
 0x436   :  { %v558_v43 = vpop.f32.mrf.mxu0 }
 0x437   :  { %v562_v46 = vmul.f32 %v558_v43, %v527_v42  ;;  %v686_v43 = vpop.xlane.xlu0 %685 }
 0x438   :  { %vm698_vm5 = vweird.f32 %v686_v43  ;;  %vm690_vm11 = vcmp.gt.f32.partialorder %v686_v43, 0.0 }
 0x439   :  { %583 = vmatpush.msra.mxu3 %v562_v46 }
 0x43b   :  { %584 = vmatpush.msra.mxu3 %v561_v48 }
 0x43c   :  { %914 = vmatmul.msk.f32.vlgmr.msra.gmra.mxu3 %vm310_vm7, %v1242_v35 }
 0x444   :  { %915 = vmatmul.msk.f32.gmra.mxu3 %vm310_vm7, %v1260_v45 }
 0x4bf   :  { %v586_v49 = vpop.f32.mrf.mxu3 }
 0x4c0   :  { %v592_v51 = vmul.f32 %v586_v49, %v526_v47  ;;  %v792_v47 = vld [vmem:[%s1367_s4] sm:$0xff] }
 0x4c1   :  { %vm794_vm0 = vcmp.gt.f32.partialorder %v792_v47, 0.5 }
 0x4c2   :  { %v598_v53 = vadd.f32 %v942_v52, %v592_v51  ;;  %v796_v51 = vsel %vm794_vm0, 1, %v1003_v25  ;;  %vm871_vm0 = vcmask 25600  }
 0x4c3   :  { %799 = vperm.xlu1 %935, %v796_v51  }
 0x4c4   :  { %v1282_v57 = vadd.f32 %v598_v53, %v1255_v41 }
 0x4c6   :  { %v602_v35 = vsel %vm280_vm2, %v1282_v57, 0.0 }
 0x4c7   :  { %v589_v55 = vpop.f32.mrf.mxu3 }
 0x4c8   :  { %v593_v56 = vmul.f32 %v589_v55, %v527_v42  ;;  %v689_v42 = vpop.xlane.xlu2 %688  ;;  %v793_v55 = vld [vmem:[%s1367_s4 + $0x8] sm:$0xff] }
 0x4c9   :  { %vm795_vm1 = vcmp.gt.f32.partialorder %v793_v55, 0.5  ;;  %vm708_vm3 = vweird.f32 %v689_v42  ;;  %vm691_vm10 = vcmp.gt.f32.partialorder %v689_v42, 0.0 }
 0x4ca   :  { %v599_v58 = vadd.f32 %v942_v52, %v593_v56 }
 0x4cb   :  { %937 = vset.pattern.permute.xlu1 %v1004_v38 }
 0x4cc   :  { %v1285_v60 = vadd.f32 %v599_v58, %v1257_v44  ;;  %v797_v58 = vsel %vm795_vm1, 1, %v1003_v25  ;;  %820 = vperm.xlu1 %937, %v796_v51   ;;  %v944_v51 = vld [vmem:[%s1379_s16] ss:$0 sm:$0xff] }
 0x4cd   :  { %802 = vperm.xlu0 %936, %v797_v58  }
 0x4ce   :  { %v603_v45 = vsel %vm280_vm2, %v1285_v60, 0.0 }
 0x4cf   :  { %v604_v61 = vadd.f32 %v603_v45, %v602_v35 }
 0x4d1   :  { %v605_v62 = vrot.slane %v604_v61, 4 }
 0x4d3   :  { %v606_v63 = vadd.f32 %v605_v62, %v604_v61 }
 0x4d4   :  { %823 = vperm.xlu1 %937, %v797_v58  }
 0x4d5   :  { %v607_v0 = vrot.slane %v606_v63, 2  ;;  %938 = vset.pattern.permute.xlu0 %v1004_v38 }
 0x4d7   :  { %v608_v6 = vadd.f32 %v607_v0, %v606_v63 }
 0x4d9   :  { %v609_v59 = vrot.slane %v608_v6, 1 }
 0x4db   :  { %v610_v5 = vadd.f32 %v609_v59, %v608_v6 }
 0x4dd   :  { %v611_v9 = vmul.f32 0.0625, %v610_v5 }
 0x4df   :  { %v612_v12 = vsub.f32 %v1282_v57, %v611_v9  ;;  %v613_v13 = vsub.f32 %v1285_v60, %v611_v9 }
 0x4e1   :  { %v614_v15 = vmul.f32 %v612_v12, %v612_v12  ;;  %v615_v16 = vmul.f32 %v613_v13, %v613_v13 }
 0x4e3   :  { %v616_v17 = vsel %vm280_vm2, %v614_v15, 0.0  ;;  %v617_v18 = vsel %vm280_vm2, %v615_v16, 0.0  ;;  %v840_v16 = vld [vmem:[%s1378_s15] sm:$0xff] }
 0x4e4   :  { %v618_v19 = vadd.f32 %v617_v18, %v616_v17 }
 0x4e6   :  { %v619_v20 = vrot.slane %v618_v19, 4 }
 0x4e8   :  { %v620_v22 = vadd.f32 %v619_v20, %v618_v19 }
 0x4ea   :  { %v621_v23 = vrot.slane %v620_v22, 2 }
 0x4ec   :  { %v622_v50 = vadd.f32 %v621_v23, %v620_v22 }
 0x4ee   :  { %v623_v24 = vrot.slane %v622_v50, 1 }
 0x4f0   :  { %v624_v28 = vadd.f32 %v623_v24, %v622_v50 }
 0x4f2   :  { %v625_v21 = vmul.f32 0.0625, %v624_v28 }
 0x4f4   :  { %v626_v29 = vadd.f32 1e-05, %v625_v21 }
 0x4f6   :  { %971 = vrsqrt.f32 %v626_v29  ;;  %vm633_vm14 = vweird.f32 %v626_v29 }
 0x4f7   :  { %973 = vrsqrt.f32 %v689_v42 }
 0x4f8   :  { %975 = vrsqrt.f32 %v686_v43 }
 0x4fc   :  { %v972_v31 = vpop.eup %971 }
 0x4fd   :  { %v628_v32 = vmul.f32 %v972_v31, %v626_v29  ;;  %vm634_vm13 = vweird.f32 %v972_v31  ;;  %v974_v46 = vpop.eup %973 }
 0x4fe   :  { %vm635_vm15 = vmor %vm633_vm14, %vm634_vm13  ;;  %v976_v48 = vpop.eup %975  ;;  %v703_v49 = vmul.f32 %v974_v46, %v689_v42  ;;  %vm709_vm4 = vweird.f32 %v974_v46 }
 0x4ff   :  { %v629_v27 = vmul.f32 %v972_v31, %v628_v32  ;;  %v693_v52 = vmul.f32 %v976_v48, %v686_v43  ;;  %vm699_vm6 = vweird.f32 %v976_v48  ;;  %vm710_vm8 = vmor %vm708_vm3, %vm709_vm4 }
 0x500   :  { %v704_v53 = vmul.f32 %v974_v46, %v703_v49  ;;  %vm700_vm9 = vmor %vm698_vm5, %vm699_vm6 }
 0x501   :  { %v630_v34 = vmul.f32 0.5, %v629_v27  ;;  %v694_v56 = vmul.f32 %v976_v48, %v693_v52 }
 0x502   :  { %v705_v35 = vmul.f32 0.5, %v704_v53 }
 0x503   :  { %v631_v26 = vsub.f32 1.5, %v630_v34  ;;  %v695_v45 = vmul.f32 0.5, %v694_v56 }
 0x504   :  { %v706_v61 = vsub.f32 1.5, %v705_v35 }
 0x505   :  { %v632_v30 = vmul.f32 %v972_v31, %v631_v26  ;;  %v696_v62 = vsub.f32 1.5, %v695_v45 }
 0x506   :  { %v707_v0 = vmul.f32 %v974_v46, %v706_v61 }
 0x507   :  { %v636_v33 = vsel %vm635_vm15, %v972_v31, %v632_v30  ;;  %v697_v1 = vmul.f32 %v976_v48, %v696_v62  ;;  %vm817_vm15 = vcmask 253952  }
 0x508   :  { %v637_v36 = vmul.f32 %v636_v33, %v612_v12  ;;  %v638_v39 = vmul.f32 %v636_v33, %v613_v13  ;;  %v711_v25 = vsel %vm710_vm8, %v974_v46, %v707_v0  ;;  %v843_v12 = vld [vmem:[%s1378_s15 + $0x18] sm:$0xff]  ;;  %v842_v13 = vld [vmem:[%s1378_s15 + $0x10] sm:$0xff] }
 0x509   :  { %v701_v3 = vsel %vm700_vm9, %v976_v48, %v697_v1  ;;  %v713_v4 = vsel %vm691_vm10, %v711_v25, 0.0  ;;  %863 = vmatpush.msrb.mxu3 %v843_v12 }
 0x50a   :  { %v639_v37 = vmax.f32 %v637_v36, 0.0  ;;  %v640_v40 = vmax.f32 %v638_v39, 0.0  ;;  %v712_v8 = vsel %vm690_vm11, %v701_v3, 0.0 }
 0x50b   :  { %864 = vmatpush.msrb.mxu3 %v842_v13 }
 0x50c   :  { %918 = vmatmul.msk.f32.vlgmr.msra.gmra.mxu2 %vm280_vm2, %v639_v37 }
 0x514   :  { %919 = vmatmul.msk.f32.gmra.mxu2 %vm280_vm2, %v640_v40 }
 0x535   :  { %v800_v38 = vpop.permute.xlu1 %799 }
 0x536   :  { %vm804_vm12 = vcmp.eq.s32.totalorder %v800_v38, 1 }
 0x53e   :  { %v821_v14 = vpop.permute.xlu1 %820 }
 0x53f   :  { %v803_v22 = vpop.permute.xlu0 %802 }
 0x540   :  { %vm805_vm13 = vcmp.eq.s32.totalorder %v803_v22, 1 }
 0x546   :  { %v824_v50 = vpop.permute.xlu1 %823 }
 0x547   :  { %vm826_vm14 = vcmp.eq.s32.totalorder %v824_v50, 1 }
 0x58f   :  { %v741_v63 = vpop.f32.mrf.mxu2 }
 0x590   :  { %v747_v59 = vmul.f32 %v741_v63, %v712_v8 }
 0x597   :  { %v744_v6 = vpop.f32.mrf.mxu2 }
 0x598   :  { %v748_v7 = vmul.f32 %v744_v6, %v713_v4 }
 0x59a   :  { %769 = vmatpush.msra.mxu0 %v748_v7 }
 0x59c   :  { %770 = vmatpush.msra.mxu0 %v747_v59 }
 0x59d   :  { %920 = vmatmul.msk.f32.vlgmr.msra.gmra.mxu0 %vm310_vm7, %v1292_v2 }
 0x5a5   :  { %921 = vmatmul.msk.f32.gmra.mxu0 %vm310_vm7, %v1309_v11  ;;  %v841_v11 = vld [vmem:[%s1378_s15 + $0x8] sm:$0xff]  ;;  %vm825_vm7 = vcmp.eq.s32.totalorder %v821_v14, 1 }
 0x5a6   :  { %865 = vmatpush.msrb.mxu3 %v841_v11 }
 0x5a8   :  { %866 = vmatpush.msrb.mxu3 %v840_v16 }
 0x61a   :  { %v772_v5 = vpop.f32.mrf.mxu0 }
 0x61b   :  { %v778_v9 = vmul.f32 %v772_v5, %v712_v8 }
 0x61d   :  { %v784_v10 = vadd.f32 %v943_v54, %v778_v9 }
 0x61f   :  { %v786_v2 = vadd.f32 %v784_v10, %v1255_v41 }
 0x621   :  { %v788_v17 = vadd.f32 %v786_v2, %v1282_v57 }
 0x622   :  { %v775_v15 = vpop.f32.mrf.mxu0 }
 0x623   :  { %v779_v18 = vmul.f32 %v775_v15, %v713_v4  ;;  %v790_v20 = vmax.f32 %v788_v17, 0.0 }
 0x625   :  { %v785_v19 = vadd.f32 %v943_v54, %v779_v18  ;;  %v806_v24 = vsel %vm804_vm12, %v790_v20, -3.4028235e+38  ;;  %v827_v28 = vsel %vm825_vm7, %v790_v20, -3.4028235e+38 }
 0x626   :  { %v808_v31 = vsel %vm280_vm2, %v806_v24, -inf  ;;  %v829_v32 = vsel %vm280_vm2, %v827_v28, -inf }
 0x627   :  { %v787_v41 = vadd.f32 %v785_v19, %v1257_v44 }
 0x629   :  { %v789_v23 = vadd.f32 %v787_v41, %v1285_v60 }
 0x62b   :  { %v791_v21 = vmax.f32 %v789_v23, 0.0 }
 0x62d   :  { %v807_v29 = vsel %vm805_vm13, %v791_v21, -3.4028235e+38  ;;  %v828_v57 = vsel %vm826_vm14, %v791_v21, -3.4028235e+38 }
 0x62e   :  { %v809_v27 = vsel %vm280_vm2, %v807_v29, -inf  ;;  %v830_v44 = vsel %vm280_vm2, %v828_v57, -inf }
 0x62f   :  { %v810_v34 = vmax.f32 %v808_v31, %v809_v27  ;;  %v831_v26 = vmax.f32 %v829_v32, %v830_v44 }
 0x631   :  { %v811_v60 = vrot.slane %v810_v34, 4  ;;  %v832_v30 = vrot.slane %v831_v26, 4 }
 0x633   :  { %v812_v33 = vmax.f32 %v810_v34, %v811_v60  ;;  %v833_v36 = vmax.f32 %v831_v26, %v832_v30 }
 0x635   :  { %v813_v37 = vrot.slane %v812_v33, 2  ;;  %v834_v39 = vrot.slane %v833_v36, 2 }
 0x637   :  { %v814_v40 = vmax.f32 %v812_v33, %v813_v37  ;;  %v835_v42 = vmax.f32 %v833_v36, %v834_v39 }
 0x639   :  { %v815_v43 = vrot.slane %v814_v40, 1  ;;  %v836_v46 = vrot.slane %v835_v42, 1 }
 0x63b   :  { %v816_v47 = vmax.f32 %v814_v40, %v815_v43  ;;  %v837_v48 = vmax.f32 %v835_v42, %v836_v46 }
 0x63d   :  { %818 = vst.msk [vmem:[#allocation2] sm:$0x1] %vm817_vm15, %v816_v47 }
 0x63e   :  { %838 = vst.msk [vmem:[#allocation2 + $0x1] sm:$0x1] %vm817_vm15, %v837_v48 }
 0x645   :  { %v839_v49 = vld [vmem:[#allocation2] sm:$0x3] }
 0x646   :  { %922 = vmatmul.msk.f32.vlgmr.msrb.gmra.mxu3 %vm280_vm2, %v839_v49 }
 0x6c9   :  { %v868_v52 = vpop.f32.mrf.mxu3 }
 0x6ca   :  { %v869_v53 = vadd.f32 %v944_v51, %v868_v52 }
 0x6cc   :  { %872 = vst.msk [vmem:[#allocation3] sm:$0x3] %vm871_vm0, %v869_v53 }
 0x6cd   :  { %883 = dma.vmem_to_hbm [thread:$0]  %s879_s5, 32, %s881_s11, [#allocation4]  }
 0x6ce   :  { %1001 = dma.done.wait [#allocation4], 32  }
 0x6cf   :  { %1002 = vsyncadd [#allocation4], 4294967264 }
 0x6d0   :  { %888 = vsyncpa [#allocation4], 1 }

</bundles_post_ra>
